<compile_context>
chip_gen: v5e
topology: v5e:2x2
jax: 0.10.0
libtpu: 0.0.40
codegen_flags: <defaults>
</compile_context>

<pallas_src>
import numpy as np
import jax
import jax.numpy as jnp
from jax.experimental import pallas as pl
from jax.experimental.pallas import tpu as pltpu


# ----------------------------------------------------------------------------
# Pallas kernel
# ----------------------------------------------------------------------------
def _make_residual_kernel(H, W, N, Cin, Cmid, Cout, has_skip_conv, offs):
    """offs = (o_s1, o_t1, o_c1, o_c2, o_bo) row offsets into the stacked consts."""
    f32, bf16 = jnp.float32, jnp.bfloat16
    o_s1, o_t1, o_c1, o_c2, o_bo = offs

    def kernel(x_ref, c_ref, w1_ref, w2_ref, w3_ref, *rest):
        if has_skip_conv:
            ws_ref, mask_ref, out_ref = rest
        else:
            mask_ref, out_ref = rest

        x = x_ref[...]                                      # (Cin, N) f32
        s1 = c_ref[o_s1:o_s1 + Cin, :]                      # bn1 scale
        t1 = c_ref[o_t1:o_t1 + Cin, :]                      # bn1 shift
        c1 = c_ref[o_c1:o_c1 + Cmid, :]                     # s2*b1 + t2
        c2 = c_ref[o_c2:o_c2 + Cmid, :]                     # s3*b2 + t3
        bo = c_ref[o_bo:o_bo + Cout, :]                     # b3 (+ bs)

        # --- cbr1: BN -> ReLU -> 1x1 conv (bn2 folded into w1 / c1) ----------
        y1 = jnp.maximum(x * s1 + t1, 0.0)                  # f32 VPU
        y2 = jnp.dot(w1_ref[...], y1.astype(bf16),
                     preferred_element_type=f32) + c1
        y2 = jnp.maximum(y2, 0.0)                           # (Cmid, N) f32

        # --- cbr2: 3x3 conv, pad=1, as 9 rolled+masked taps accumulated on MXU
        # tap_t[p] = y2[p + off_t]; masks zero every position whose source pixel
        # is out of range (this also kills circular-roll / cross-image bleed).
        acc = None
        for t in range(9):
            ky, kx = t // 3, t % 3
            off = (ky - 1) * W + (kx - 1)                   # flattened tap offset
            if off == 0:
                tap = y2                                    # center tap: no mask needed
            else:
                tap = pltpu.roll(y2, (-off) % N, 1) * mask_ref[t:t + 1, :]
            d = jnp.dot(w2_ref[t], tap.astype(bf16), preferred_element_type=f32)
            acc = d if acc is None else acc + d
        y3 = jnp.maximum(acc + c2, 0.0)                     # (Cmid, N) f32

        # --- cbr3: 1x1 conv (Cmid -> Cout) ------------------------------------
        h3 = jnp.dot(w3_ref[...], y3.astype(bf16), preferred_element_type=f32)

        # --- skip --------------------------------------------------------------
        if has_skip_conv:
            sk = jnp.dot(ws_ref[...], x.astype(bf16), preferred_element_type=f32)
        else:
            sk = x                                          # identity (Cin == Cout)
        out_ref[...] = h3 + sk + bo

    return kernel


# ----------------------------------------------------------------------------
# Wrapper
# ----------------------------------------------------------------------------
def _fold_bn(gamma, beta, mean, var, eps=1e-5):
    scale = gamma / jnp.sqrt(var + eps)
    shift = beta - mean * scale
    return scale, shift


def _tap_masks(H, W):
    """mask[t, h*W+w] = 1 iff source pixel (h+ky-1, w+kx-1) is in range, t=ky*3+kx."""
    hh, ww = np.meshgrid(np.arange(H), np.arange(W), indexing="ij")
    m = np.zeros((9, H * W), np.float32)
    for t in range(9):
        dy, dx = t // 3 - 1, t % 3 - 1
        valid = (hh + dy >= 0) & (hh + dy < H) & (ww + dx >= 0) & (ww + dx < W)
        m[t] = valid.reshape(-1).astype(np.float32)
    return m


def residual_forward(x_nchw, params):
    """Residual(inChannels, outChannels) forward; x is NCHW f32, returns NCHW f32."""
    B, Cin, H, W = x_nchw.shape
    S = H * W
    N = B * S
    Cmid = params["w1"].shape[0]
    Cout = params["w3"].shape[0]
    has_skip_conv = "ws" in params
    if not has_skip_conv:
        assert Cin == Cout, "identity skip requires Cin == Cout"
    f32, bf16 = jnp.float32, jnp.bfloat16

    # Fold inference-mode BatchNorm into per-channel scale/shift.
    s1, t1 = _fold_bn(params["gamma1"], params["beta1"], params["mean1"], params["var1"])
    s2, t2 = _fold_bn(params["gamma2"], params["beta2"], params["mean2"], params["var2"])
    s3, t3 = _fold_bn(params["gamma3"], params["beta3"], params["mean3"], params["var3"])

    # Algebraic folding:
    #   y2 = relu((s2 (.) W1) y1 + (s2*b1 + t2))
    #   y3 = relu(sum_t (s3 (.) W2_t) tap_t + (s3*b2 + t3))
    #   out = W3 y3 + skip + (b3 [+ bs])
    w1 = (s2[:, None] * params["w1"].reshape(Cmid, Cin).astype(f32)).astype(bf16)
    c1 = s2 * params["b1"] + t2
    w2 = jnp.transpose(params["w2"].astype(f32), (2, 3, 0, 1)).reshape(9, Cmid, Cmid)
    w2 = (s3[None, :, None] * w2).astype(bf16)              # (9, O, I), t = ky*3+kx
    c2 = s3 * params["b2"] + t3
    w3 = params["w3"].reshape(Cout, Cmid).astype(bf16)
    b_out = params["b3"].astype(f32)
    if has_skip_conv:
        ws = params["ws"].reshape(Cout, Cin).astype(bf16)
        b_out = b_out + params["bs"].astype(f32)

    # Stack all per-channel constants into ONE column operand (8-row aligned segments).
    rup8 = lambda n: -(-n // 8) * 8
    segs = [(s1, Cin), (t1, Cin), (c1, Cmid), (c2, Cmid), (b_out, Cout)]
    offs, cur = [], 0
    for _, c in segs:
        offs.append(cur)
        cur += rup8(c)
    CT = cur
    consts = jnp.zeros((CT, 1), f32)
    for (v, c), o in zip(segs, offs):
        consts = consts.at[o:o + c, 0].set(v.astype(f32))

    # Per-tap validity masks, tiled per image (positions b*S .. (b+1)*S).
    mask = jnp.asarray(np.tile(_tap_masks(H, W), (1, B)))    # (9, N) f32

    # Lane-dense layout: channels on sublanes, flattened (batch, spatial) on lanes.
    x_flat = jnp.transpose(x_nchw.astype(f32), (1, 0, 2, 3)).reshape(Cin, N)

    kernel = _make_residual_kernel(H, W, N, Cin, Cmid, Cout, has_skip_conv, tuple(offs))

    operands = [x_flat, consts, w1, w2, w3]
    in_specs = [
        pl.BlockSpec((Cin, N), lambda i: (0, 0)),            # x
        pl.BlockSpec((CT, 1), lambda i: (0, 0)),              # stacked constants
        pl.BlockSpec((Cmid, Cin), lambda i: (0, 0)),           # conv1 weight (bn2 folded)
        pl.BlockSpec((9, Cmid, Cmid), lambda i: (0, 0, 0)),    # conv2 per-tap weights (bn3 folded)
        pl.BlockSpec((Cout, Cmid), lambda i: (0, 0)),          # conv3 weight
    ]
    if has_skip_conv:
        operands.append(ws)
        in_specs.append(pl.BlockSpec((Cout, Cin), lambda i: (0, 0)))
    operands.append(mask)
    in_specs.append(pl.BlockSpec((9, N), lambda i: (0, 0)))

    out_flat = pl.pallas_call(
        kernel,
        out_shape=jax.ShapeDtypeStruct((Cout, N), f32),
        grid=(1,),
        in_specs=in_specs,
        out_specs=pl.BlockSpec((Cout, N), lambda i: (0, 0)),
        compiler_params=pltpu.CompilerParams(
            dimension_semantics=("arbitrary",),
            vmem_limit_bytes=32 * 1024 * 1024),
    )(*operands)

    return jnp.transpose(out_flat.reshape(Cout, B, H, W), (1, 0, 2, 3))


# ----------------------------------------------------------------------------
# Pure-JAX reference (PyTorch-style ops, inference-mode BN) for validation
# ----------------------------------------------------------------------------
def residual_reference(x, p, eps=1e-5):
    hp = jax.lax.Precision.HIGHEST

    def bn(h, g, b, m, v):
        g, b, m, v = (a[None, :, None, None] for a in (g, b, m, v))
        return (h - m) / jnp.sqrt(v + eps) * g + b

    def conv(h, w, b, pad):
        y = jax.lax.conv_general_dilated(
            h, w, window_strides=(1, 1), padding=((pad, pad), (pad, pad)),
            dimension_numbers=("NCHW", "OIHW", "NCHW"), precision=hp)
        return y + b[None, :, None, None]

    h = conv(jax.nn.relu(bn(x, p["gamma1"], p["beta1"], p["mean1"], p["var1"])),
             p["w1"], p["b1"], 0)
    h = conv(jax.nn.relu(bn(h, p["gamma2"], p["beta2"], p["mean2"], p["var2"])),
             p["w2"], p["b2"], 1)
    h = conv(jax.nn.relu(bn(h, p["gamma3"], p["beta3"], p["mean3"], p["var3"])),
             p["w3"], p["b3"], 0)
    skip = conv(x, p["ws"], p["bs"], 0) if "ws" in p else x
    return h + skip


# ----------------------------------------------------------------------------
if __name__ == "__main__":
    def make_params(key, Cin, Cout, with_skip):
        Cmid = Cout // 2
        keys = iter(jax.random.split(key, 40))
        normal = lambda shape, s=1.0: s * jax.random.normal(next(keys), shape, dtype=jnp.float32)
        uniform = lambda shape, lo, hi: jax.random.uniform(next(keys), shape, jnp.float32, lo, hi)
        p = {
            "gamma1": 1.0 + normal((Cin,), 0.1), "beta1": normal((Cin,), 0.1),
            "mean1": normal((Cin,), 0.2), "var1": uniform((Cin,), 0.5, 1.5),
            "w1": normal((Cmid, Cin, 1, 1), 0.3), "b1": normal((Cmid,), 0.1),
            "gamma2": 1.0 + normal((Cmid,), 0.1), "beta2": normal((Cmid,), 0.1),
            "mean2": normal((Cmid,), 0.2), "var2": uniform((Cmid,), 0.5, 1.5),
            "w2": normal((Cmid, Cmid, 3, 3), 0.3), "b2": normal((Cmid,), 0.1),
            "gamma3": 1.0 + normal((Cmid,), 0.1), "beta3": normal((Cmid,), 0.1),
            "mean3": normal((Cmid,), 0.2), "var3": uniform((Cmid,), 0.5, 1.5),
            "w3": normal((Cout, Cmid, 1, 1), 0.3), "b3": normal((Cout,), 0.1),
        }
        if with_skip:
            p["ws"] = normal((Cout, Cin, 1, 1), 0.3)
            p["bs"] = normal((Cout,), 0.1)
        return p

    run = jax.jit(residual_forward)
    # Tolerance reflects bf16 MXU operands across three chained matmuls (f32
    # accumulation); structural bugs produce O(1) errors, far above this.
    TOL = dict(rtol=5e-2, atol=5e-2)

    # Case 1: Cin != Cout -> 1x1 skip conv.
    B, Cin, Cout, RES = 2, 4, 8, 16
    x = jax.random.normal(jax.random.PRNGKey(0), (B, Cin, RES, RES), dtype=jnp.float32)
    params = make_params(jax.random.PRNGKey(1), Cin, Cout, with_skip=True)
    out = jax.block_until_ready(run(x, params))
    ref = residual_reference(x, params)
    np.testing.assert_allclose(np.asarray(out), np.asarray(ref), **TOL)
    assert out.shape == (B, Cout, RES, RES)

    # Case 2: Cin == Cout -> identity skip (kernel variant without ws/bs operands).
    Cin2 = Cout2 = 8
    x2 = jax.random.normal(jax.random.PRNGKey(2), (B, Cin2, RES, RES), dtype=jnp.float32)
    params2 = make_params(jax.random.PRNGKey(3), Cin2, Cout2, with_skip=False)
    out2 = jax.block_until_ready(run(x2, params2))
    ref2 = residual_reference(x2, params2)
    np.testing.assert_allclose(np.asarray(out2), np.asarray(ref2), **TOL)
    assert out2.shape == (B, Cout2, RES, RES)

    print("KERNEL_OK")
</pallas_src>

<mosaic_0001>
module attributes {stable_mosaic.version = 11 : i64} {
  func.func @kernel(%arg0: i32, %arg1: memref<4x512xf32, #tpu.memory_space<vmem>>, %arg2: memref<40x1xf32, #tpu.memory_space<vmem>>, %arg3: memref<4x4xbf16, #tpu.memory_space<vmem>>, %arg4: memref<9x4x4xbf16, #tpu.memory_space<vmem>>, %arg5: memref<8x4xbf16, #tpu.memory_space<vmem>>, %arg6: memref<8x4xbf16, #tpu.memory_space<vmem>>, %arg7: memref<9x512xf32, #tpu.memory_space<vmem>>, %arg8: memref<8x512xf32, #tpu.memory_space<vmem>>) attributes {dimension_semantics = [#tpu.dimension_semantics<arbitrary>], iteration_bounds = array<i64: 1>, scalar_prefetch = 0 : i64, scratch_operands = 0 : i64, tpu.core_type = #tpu.core_type<tc>, window_params = [{pipeline_mode = #tpu.pipeline_mode<synchronous>, transform_indices = @transform_0, window_bounds = array<i64: 4, 512>}, {pipeline_mode = #tpu.pipeline_mode<synchronous>, transform_indices = @transform_1, window_bounds = array<i64: 40, 1>}, {pipeline_mode = #tpu.pipeline_mode<synchronous>, transform_indices = @transform_2, window_bounds = array<i64: 4, 4>}, {pipeline_mode = #tpu.pipeline_mode<synchronous>, transform_indices = @transform_3, window_bounds = array<i64: 9, 4, 4>}, {pipeline_mode = #tpu.pipeline_mode<synchronous>, transform_indices = @transform_4, window_bounds = array<i64: 8, 4>}, {pipeline_mode = #tpu.pipeline_mode<synchronous>, transform_indices = @transform_5, window_bounds = array<i64: 8, 4>}, {pipeline_mode = #tpu.pipeline_mode<synchronous>, transform_indices = @transform_6, window_bounds = array<i64: 9, 512>}, {pipeline_mode = #tpu.pipeline_mode<synchronous>, transform_indices = @transform_7, window_bounds = array<i64: 8, 512>}]} {
    %c0 = arith.constant 0 : index
    %c0_0 = arith.constant 0 : index
    %0 = vector.load %arg1[%c0, %c0_0] : memref<4x512xf32, #tpu.memory_space<vmem>>, vector<4x512xf32>
    %c0_1 = arith.constant 0 : index
    %c0_2 = arith.constant 0 : index
    %1 = vector.load %arg2[%c0_1, %c0_2] : memref<40x1xf32, #tpu.memory_space<vmem>>, vector<4x1xf32>
    %c8 = arith.constant 8 : index
    %c0_3 = arith.constant 0 : index
    %2 = vector.load %arg2[%c8, %c0_3] : memref<40x1xf32, #tpu.memory_space<vmem>>, vector<4x1xf32>
    %c16 = arith.constant 16 : index
    %c0_4 = arith.constant 0 : index
    %3 = vector.load %arg2[%c16, %c0_4] : memref<40x1xf32, #tpu.memory_space<vmem>>, vector<4x1xf32>
    %c24 = arith.constant 24 : index
    %c0_5 = arith.constant 0 : index
    %4 = vector.load %arg2[%c24, %c0_5] : memref<40x1xf32, #tpu.memory_space<vmem>>, vector<4x1xf32>
    %c32 = arith.constant 32 : index
    %c0_6 = arith.constant 0 : index
    %5 = vector.load %arg2[%c32, %c0_6] : memref<40x1xf32, #tpu.memory_space<vmem>>, vector<8x1xf32>
    %6 = vector.broadcast %1 : vector<4x1xf32> to vector<4x512xf32>
    %7 = arith.mulf %0, %6 : vector<4x512xf32>
    %8 = vector.broadcast %2 : vector<4x1xf32> to vector<4x512xf32>
    %9 = arith.addf %7, %8 : vector<4x512xf32>
    %cst = arith.constant 0.000000e+00 : f32
    %10 = vector.broadcast %cst : f32 to vector<4x512xf32>
    %11 = arith.maximumf %9, %10 : vector<4x512xf32>
    %c0_7 = arith.constant 0 : index
    %c0_8 = arith.constant 0 : index
    %12 = vector.load %arg3[%c0_7, %c0_8] : memref<4x4xbf16, #tpu.memory_space<vmem>>, vector<4x4xbf16>
    %13 = arith.truncf %11 : vector<4x512xf32> to vector<4x512xbf16>
    %cst_9 = arith.constant dense<0.000000e+00> : vector<4x512xf32>
    %14 = tpu.matmul %12, %13, %cst_9 {dimension_numbers = #tpu.dot_dimension_numbers<[1], [0], [0], [1], [0, 0, 1, 1], [], []>} : vector<4x4xbf16>, vector<4x512xbf16>, vector<4x512xf32> -> vector<4x512xf32>
    %15 = vector.broadcast %3 : vector<4x1xf32> to vector<4x512xf32>
    %16 = arith.addf %14, %15 : vector<4x512xf32>
    %cst_10 = arith.constant 0.000000e+00 : f32
    %17 = vector.broadcast %cst_10 : f32 to vector<4x512xf32>
    %18 = arith.maximumf %16, %17 : vector<4x512xf32>
    %c17_i32 = arith.constant 17 : i32
    %19 = tpu.dynamic_rotate %18 by %c17_i32 dim 1 : vector<4x512xf32>, i32 -> vector<4x512xf32>
    %c0_11 = arith.constant 0 : index
    %c0_12 = arith.constant 0 : index
    %20 = vector.load %arg7[%c0_11, %c0_12] : memref<9x512xf32, #tpu.memory_space<vmem>>, vector<1x512xf32>
    %21 = vector.broadcast %20 : vector<1x512xf32> to vector<4x512xf32>
    %22 = arith.mulf %19, %21 : vector<4x512xf32>
    %c0_13 = arith.constant 0 : index
    %c0_14 = arith.constant 0 : index
    %c0_15 = arith.constant 0 : index
    %23 = vector.load %arg4[%c0_13, %c0_14, %c0_15] : memref<9x4x4xbf16, #tpu.memory_space<vmem>>, vector<1x4x4xbf16>
    %24 = vector.shape_cast %23 : vector<1x4x4xbf16> to vector<4x4xbf16>
    %25 = arith.truncf %22 : vector<4x512xf32> to vector<4x512xbf16>
    %cst_16 = arith.constant dense<0.000000e+00> : vector<4x512xf32>
    %26 = tpu.matmul %24, %25, %cst_16 {dimension_numbers = #tpu.dot_dimension_numbers<[1], [0], [0], [1], [0, 0, 1, 1], [], []>} : vector<4x4xbf16>, vector<4x512xbf16>, vector<4x512xf32> -> vector<4x512xf32>
    %c16_i32 = arith.constant 16 : i32
    %27 = tpu.dynamic_rotate %18 by %c16_i32 dim 1 : vector<4x512xf32>, i32 -> vector<4x512xf32>
    %c1 = arith.constant 1 : index
    %c0_17 = arith.constant 0 : index
    %28 = vector.load %arg7[%c1, %c0_17] : memref<9x512xf32, #tpu.memory_space<vmem>>, vector<1x512xf32>
    %29 = vector.broadcast %28 : vector<1x512xf32> to vector<4x512xf32>
    %30 = arith.mulf %27, %29 : vector<4x512xf32>
    %c1_18 = arith.constant 1 : index
    %c0_19 = arith.constant 0 : index
    %c0_20 = arith.constant 0 : index
    %31 = vector.load %arg4[%c1_18, %c0_19, %c0_20] : memref<9x4x4xbf16, #tpu.memory_space<vmem>>, vector<1x4x4xbf16>
    %32 = vector.shape_cast %31 : vector<1x4x4xbf16> to vector<4x4xbf16>
    %33 = arith.truncf %30 : vector<4x512xf32> to vector<4x512xbf16>
    %cst_21 = arith.constant dense<0.000000e+00> : vector<4x512xf32>
    %34 = tpu.matmul %32, %33, %cst_21 {dimension_numbers = #tpu.dot_dimension_numbers<[1], [0], [0], [1], [0, 0, 1, 1], [], []>} : vector<4x4xbf16>, vector<4x512xbf16>, vector<4x512xf32> -> vector<4x512xf32>
    %35 = arith.addf %26, %34 : vector<4x512xf32>
    %c15_i32 = arith.constant 15 : i32
    %36 = tpu.dynamic_rotate %18 by %c15_i32 dim 1 : vector<4x512xf32>, i32 -> vector<4x512xf32>
    %c2 = arith.constant 2 : index
    %c0_22 = arith.constant 0 : index
    %37 = vector.load %arg7[%c2, %c0_22] : memref<9x512xf32, #tpu.memory_space<vmem>>, vector<1x512xf32>
    %38 = vector.broadcast %37 : vector<1x512xf32> to vector<4x512xf32>
    %39 = arith.mulf %36, %38 : vector<4x512xf32>
    %c2_23 = arith.constant 2 : index
    %c0_24 = arith.constant 0 : index
    %c0_25 = arith.constant 0 : index
    %40 = vector.load %arg4[%c2_23, %c0_24, %c0_25] : memref<9x4x4xbf16, #tpu.memory_space<vmem>>, vector<1x4x4xbf16>
    %41 = vector.shape_cast %40 : vector<1x4x4xbf16> to vector<4x4xbf16>
    %42 = arith.truncf %39 : vector<4x512xf32> to vector<4x512xbf16>
    %cst_26 = arith.constant dense<0.000000e+00> : vector<4x512xf32>
    %43 = tpu.matmul %41, %42, %cst_26 {dimension_numbers = #tpu.dot_dimension_numbers<[1], [0], [0], [1], [0, 0, 1, 1], [], []>} : vector<4x4xbf16>, vector<4x512xbf16>, vector<4x512xf32> -> vector<4x512xf32>
    %44 = arith.addf %35, %43 : vector<4x512xf32>
    %c1_i32 = arith.constant 1 : i32
    %45 = tpu.dynamic_rotate %18 by %c1_i32 dim 1 : vector<4x512xf32>, i32 -> vector<4x512xf32>
    %c3 = arith.constant 3 : index
    %c0_27 = arith.constant 0 : index
    %46 = vector.load %arg7[%c3, %c0_27] : memref<9x512xf32, #tpu.memory_space<vmem>>, vector<1x512xf32>
    %47 = vector.broadcast %46 : vector<1x512xf32> to vector<4x512xf32>
    %48 = arith.mulf %45, %47 : vector<4x512xf32>
    %c3_28 = arith.constant 3 : index
    %c0_29 = arith.constant 0 : index
    %c0_30 = arith.constant 0 : index
    %49 = vector.load %arg4[%c3_28, %c0_29, %c0_30] : memref<9x4x4xbf16, #tpu.memory_space<vmem>>, vector<1x4x4xbf16>
    %50 = vector.shape_cast %49 : vector<1x4x4xbf16> to vector<4x4xbf16>
    %51 = arith.truncf %48 : vector<4x512xf32> to vector<4x512xbf16>
    %cst_31 = arith.constant dense<0.000000e+00> : vector<4x512xf32>
    %52 = tpu.matmul %50, %51, %cst_31 {dimension_numbers = #tpu.dot_dimension_numbers<[1], [0], [0], [1], [0, 0, 1, 1], [], []>} : vector<4x4xbf16>, vector<4x512xbf16>, vector<4x512xf32> -> vector<4x512xf32>
    %53 = arith.addf %44, %52 : vector<4x512xf32>
    %c4 = arith.constant 4 : index
    %c0_32 = arith.constant 0 : index
    %c0_33 = arith.constant 0 : index
    %54 = vector.load %arg4[%c4, %c0_32, %c0_33] : memref<9x4x4xbf16, #tpu.memory_space<vmem>>, vector<1x4x4xbf16>
    %55 = vector.shape_cast %54 : vector<1x4x4xbf16> to vector<4x4xbf16>
    %56 = arith.truncf %18 : vector<4x512xf32> to vector<4x512xbf16>
    %cst_34 = arith.constant dense<0.000000e+00> : vector<4x512xf32>
    %57 = tpu.matmul %55, %56, %cst_34 {dimension_numbers = #tpu.dot_dimension_numbers<[1], [0], [0], [1], [0, 0, 1, 1], [], []>} : vector<4x4xbf16>, vector<4x512xbf16>, vector<4x512xf32> -> vector<4x512xf32>
    %58 = arith.addf %53, %57 : vector<4x512xf32>
    %c511_i32 = arith.constant 511 : i32
    %59 = tpu.dynamic_rotate %18 by %c511_i32 dim 1 : vector<4x512xf32>, i32 -> vector<4x512xf32>
    %c5 = arith.constant 5 : index
    %c0_35 = arith.constant 0 : index
    %60 = vector.load %arg7[%c5, %c0_35] : memref<9x512xf32, #tpu.memory_space<vmem>>, vector<1x512xf32>
    %61 = vector.broadcast %60 : vector<1x512xf32> to vector<4x512xf32>
    %62 = arith.mulf %59, %61 : vector<4x512xf32>
    %c5_36 = arith.constant 5 : index
    %c0_37 = arith.constant 0 : index
    %c0_38 = arith.constant 0 : index
    %63 = vector.load %arg4[%c5_36, %c0_37, %c0_38] : memref<9x4x4xbf16, #tpu.memory_space<vmem>>, vector<1x4x4xbf16>
    %64 = vector.shape_cast %63 : vector<1x4x4xbf16> to vector<4x4xbf16>
    %65 = arith.truncf %62 : vector<4x512xf32> to vector<4x512xbf16>
    %cst_39 = arith.constant dense<0.000000e+00> : vector<4x512xf32>
    %66 = tpu.matmul %64, %65, %cst_39 {dimension_numbers = #tpu.dot_dimension_numbers<[1], [0], [0], [1], [0, 0, 1, 1], [], []>} : vector<4x4xbf16>, vector<4x512xbf16>, vector<4x512xf32> -> vector<4x512xf32>
    %67 = arith.addf %58, %66 : vector<4x512xf32>
    %c497_i32 = arith.constant 497 : i32
    %68 = tpu.dynamic_rotate %18 by %c497_i32 dim 1 : vector<4x512xf32>, i32 -> vector<4x512xf32>
    %c6 = arith.constant 6 : index
    %c0_40 = arith.constant 0 : index
    %69 = vector.load %arg7[%c6, %c0_40] : memref<9x512xf32, #tpu.memory_space<vmem>>, vector<1x512xf32>
    %70 = vector.broadcast %69 : vector<1x512xf32> to vector<4x512xf32>
    %71 = arith.mulf %68, %70 : vector<4x512xf32>
    %c6_41 = arith.constant 6 : index
    %c0_42 = arith.constant 0 : index
    %c0_43 = arith.constant 0 : index
    %72 = vector.load %arg4[%c6_41, %c0_42, %c0_43] : memref<9x4x4xbf16, #tpu.memory_space<vmem>>, vector<1x4x4xbf16>
    %73 = vector.shape_cast %72 : vector<1x4x4xbf16> to vector<4x4xbf16>
    %74 = arith.truncf %71 : vector<4x512xf32> to vector<4x512xbf16>
    %cst_44 = arith.constant dense<0.000000e+00> : vector<4x512xf32>
    %75 = tpu.matmul %73, %74, %cst_44 {dimension_numbers = #tpu.dot_dimension_numbers<[1], [0], [0], [1], [0, 0, 1, 1], [], []>} : vector<4x4xbf16>, vector<4x512xbf16>, vector<4x512xf32> -> vector<4x512xf32>
    %76 = arith.addf %67, %75 : vector<4x512xf32>
    %c496_i32 = arith.constant 496 : i32
    %77 = tpu.dynamic_rotate %18 by %c496_i32 dim 1 : vector<4x512xf32>, i32 -> vector<4x512xf32>
    %c7 = arith.constant 7 : index
    %c0_45 = arith.constant 0 : index
    %78 = vector.load %arg7[%c7, %c0_45] : memref<9x512xf32, #tpu.memory_space<vmem>>, vector<1x512xf32>
    %79 = vector.broadcast %78 : vector<1x512xf32> to vector<4x512xf32>
    %80 = arith.mulf %77, %79 : vector<4x512xf32>
    %c7_46 = arith.constant 7 : index
    %c0_47 = arith.constant 0 : index
    %c0_48 = arith.constant 0 : index
    %81 = vector.load %arg4[%c7_46, %c0_47, %c0_48] : memref<9x4x4xbf16, #tpu.memory_space<vmem>>, vector<1x4x4xbf16>
    %82 = vector.shape_cast %81 : vector<1x4x4xbf16> to vector<4x4xbf16>
    %83 = arith.truncf %80 : vector<4x512xf32> to vector<4x512xbf16>
    %cst_49 = arith.constant dense<0.000000e+00> : vector<4x512xf32>
    %84 = tpu.matmul %82, %83, %cst_49 {dimension_numbers = #tpu.dot_dimension_numbers<[1], [0], [0], [1], [0, 0, 1, 1], [], []>} : vector<4x4xbf16>, vector<4x512xbf16>, vector<4x512xf32> -> vector<4x512xf32>
    %85 = arith.addf %76, %84 : vector<4x512xf32>
    %c495_i32 = arith.constant 495 : i32
    %86 = tpu.dynamic_rotate %18 by %c495_i32 dim 1 : vector<4x512xf32>, i32 -> vector<4x512xf32>
    %c8_50 = arith.constant 8 : index
    %c0_51 = arith.constant 0 : index
    %87 = vector.load %arg7[%c8_50, %c0_51] : memref<9x512xf32, #tpu.memory_space<vmem>>, vector<1x512xf32>
    %88 = vector.broadcast %87 : vector<1x512xf32> to vector<4x512xf32>
    %89 = arith.mulf %86, %88 : vector<4x512xf32>
    %c8_52 = arith.constant 8 : index
    %c0_53 = arith.constant 0 : index
    %c0_54 = arith.constant 0 : index
    %90 = vector.load %arg4[%c8_52, %c0_53, %c0_54] : memref<9x4x4xbf16, #tpu.memory_space<vmem>>, vector<1x4x4xbf16>
    %91 = vector.shape_cast %90 : vector<1x4x4xbf16> to vector<4x4xbf16>
    %92 = arith.truncf %89 : vector<4x512xf32> to vector<4x512xbf16>
    %cst_55 = arith.constant dense<0.000000e+00> : vector<4x512xf32>
    %93 = tpu.matmul %91, %92, %cst_55 {dimension_numbers = #tpu.dot_dimension_numbers<[1], [0], [0], [1], [0, 0, 1, 1], [], []>} : vector<4x4xbf16>, vector<4x512xbf16>, vector<4x512xf32> -> vector<4x512xf32>
    %94 = arith.addf %85, %93 : vector<4x512xf32>
    %95 = vector.broadcast %4 : vector<4x1xf32> to vector<4x512xf32>
    %96 = arith.addf %94, %95 : vector<4x512xf32>
    %cst_56 = arith.constant 0.000000e+00 : f32
    %97 = vector.broadcast %cst_56 : f32 to vector<4x512xf32>
    %98 = arith.maximumf %96, %97 : vector<4x512xf32>
    %c0_57 = arith.constant 0 : index
    %c0_58 = arith.constant 0 : index
    %99 = vector.load %arg5[%c0_57, %c0_58] : memref<8x4xbf16, #tpu.memory_space<vmem>>, vector<8x4xbf16>
    %100 = arith.truncf %98 : vector<4x512xf32> to vector<4x512xbf16>
    %cst_59 = arith.constant dense<0.000000e+00> : vector<8x512xf32>
    %101 = tpu.matmul %99, %100, %cst_59 {dimension_numbers = #tpu.dot_dimension_numbers<[1], [0], [0], [1], [0, 0, 1, 1], [], []>} : vector<8x4xbf16>, vector<4x512xbf16>, vector<8x512xf32> -> vector<8x512xf32>
    %c0_60 = arith.constant 0 : index
    %c0_61 = arith.constant 0 : index
    %102 = vector.load %arg6[%c0_60, %c0_61] : memref<8x4xbf16, #tpu.memory_space<vmem>>, vector<8x4xbf16>
    %103 = arith.truncf %0 : vector<4x512xf32> to vector<4x512xbf16>
    %cst_62 = arith.constant dense<0.000000e+00> : vector<8x512xf32>
    %104 = tpu.matmul %102, %103, %cst_62 {dimension_numbers = #tpu.dot_dimension_numbers<[1], [0], [0], [1], [0, 0, 1, 1], [], []>} : vector<8x4xbf16>, vector<4x512xbf16>, vector<8x512xf32> -> vector<8x512xf32>
    %105 = arith.addf %101, %104 : vector<8x512xf32>
    %106 = vector.broadcast %5 : vector<8x1xf32> to vector<8x512xf32>
    %107 = arith.addf %105, %106 : vector<8x512xf32>
    %c0_63 = arith.constant 0 : index
    %c0_64 = arith.constant 0 : index
    %108 = vector.load %arg8[%c0_63, %c0_64] : memref<8x512xf32, #tpu.memory_space<vmem>>, vector<8x512xf32>
    tpu.vector_store %arg8[%c0_63, %c0_64], %107 {strides = array<i32>} : memref<8x512xf32, #tpu.memory_space<vmem>>, vector<8x512xf32>,
    return
  }
  func.func @transform_0(%arg0: i32) -> (i32, i32) {
    %c0_i32 = arith.constant 0 : i32
    %c0_i32_0 = arith.constant 0 : i32
    %c0_i32_1 = arith.constant 0 : i32
    return %c0_i32, %c0_i32_0 : i32, i32
  }
  func.func @transform_1(%arg0: i32) -> (i32, i32) {
    %c0_i32 = arith.constant 0 : i32
    %c0_i32_0 = arith.constant 0 : i32
    %c0_i32_1 = arith.constant 0 : i32
    return %c0_i32, %c0_i32_0 : i32, i32
  }
  func.func @transform_2(%arg0: i32) -> (i32, i32) {
    %c0_i32 = arith.constant 0 : i32
    %c0_i32_0 = arith.constant 0 : i32
    %c0_i32_1 = arith.constant 0 : i32
    return %c0_i32, %c0_i32_0 : i32, i32
  }
  func.func @transform_3(%arg0: i32) -> (i32, i32, i32) {
    %c0_i32 = arith.constant 0 : i32
    %c0_i32_0 = arith.constant 0 : i32
    %c0_i32_1 = arith.constant 0 : i32
    %c0_i32_2 = arith.constant 0 : i32
    return %c0_i32, %c0_i32_0, %c0_i32_1 : i32, i32, i32
  }
  func.func @transform_4(%arg0: i32) -> (i32, i32) {
    %c0_i32 = arith.constant 0 : i32
    %c0_i32_0 = arith.constant 0 : i32
    %c0_i32_1 = arith.constant 0 : i32
    return %c0_i32, %c0_i32_0 : i32, i32
  }
  func.func @transform_5(%arg0: i32) -> (i32, i32) {
    %c0_i32 = arith.constant 0 : i32
    %c0_i32_0 = arith.constant 0 : i32
    %c0_i32_1 = arith.constant 0 : i32
    return %c0_i32, %c0_i32_0 : i32, i32
  }
  func.func @transform_6(%arg0: i32) -> (i32, i32) {
    %c0_i32 = arith.constant 0 : i32
    %c0_i32_0 = arith.constant 0 : i32
    %c0_i32_1 = arith.constant 0 : i32
    return %c0_i32, %c0_i32_0 : i32, i32
  }
  func.func @transform_7(%arg0: i32) -> (i32, i32) {
    %c0_i32 = arith.constant 0 : i32
    %c0_i32_0 = arith.constant 0 : i32
    %c0_i32_1 = arith.constant 0 : i32
    return %c0_i32, %c0_i32_0 : i32, i32
  }
}

</mosaic_0001>

<bundles_post_ra>
// kernel: residual_forward.1
= control target key start
LH: loop header
LB: loop body
LE: loop exit
PB: predicated region body
PF: predicated region fallthrough
CT: control target
= control target key end

     0   :  { %v1326_v0 = vmov 0   ;;  %v1327_v3 = vmov 839922192   ;;  %vm85_vm0 = vcmask 1041408   ;;  %vm81_vm1 = vcmask 31744   ;;  %s1329_s12 = smov 17   ;;  %s1685_s1 = inlined_call_operand.vmem [shape: f32[40,1], index: 1, kind: input, shape index: {}]   ;;  %s1686_s0 = inlined_call_operand.vmem [shape: f32[4,512], index: 0, kind: input, shape index: {}]   ;;  %s1687_s2 = inlined_call_operand.vmem [shape: bf16[4,4], index: 2, kind: input, shape index: {}]   ;;  %s1688_s6 = inlined_call_operand.vmem [shape: f32[9,512], index: 6, kind: input, shape index: {}]   ;;  %s1689_s3 = inlined_call_operand.vmem [shape: bf16[9,4,4], index: 3, kind: input, shape index: {}]   ;;  %s1690_s5 = inlined_call_operand.vmem [shape: bf16[8,4], index: 5, kind: input, shape index: {}]   ;;  %s1691_s4 = inlined_call_operand.vmem [shape: bf16[8,4], index: 4, kind: input, shape index: {}]   ;;  %s1692_s7 = inlined_call_operand.vmem [shape: f32[8,512], index: 7, kind: output, shape index: {}]  }
   0x1   :  { %1323 = vset.pattern.permute.xlu0 %v1326_v0  ;;  %v29_v1 = vld [vmem:[%s1685_s1] sm:$0xf]  ;;  %1324 = vset.pattern.permute.xlu1 %v1326_v0  ;;  %v30_v2 = vld [vmem:[%s1685_s1 + $0x8] sm:$0xf]  ;;  %v39_v4 = vunpack.c.l.s4 %v1327_v3  ;;  %v31_v5 = vld [vmem:[%s1685_s1 + $0x10] sm:$0xf]  ;;  %v162_v50 = vlaneseq }
   0x2   :  { %36 = vperm.xlu0 %1323, %v29_v1   ;;  %1325 = vset.pattern.permute.xlu2 %v1326_v0  ;;  %v27_v9 = vld [vmem:[%s1686_s0] sm:$0xff]  ;;  %v28_v10 = vld [vmem:[%s1686_s0 + $0x8] sm:$0xff]  ;;  %s1330_s13 = smov 15   ;;  %s1331_s14 = smov 1  }
   0x3   :  { %78 = vperm.xlu1 %1324, %v31_v5   ;;  %v40_v7 = vunpack.c.0.s8 %v39_v4  ;;  %v58_v30 = vld [vmem:[%s1687_s2] sm:$0x3]  ;;  %s1328_s2 = smov 16   ;;  %s1332_s15 = smov 127   ;;  %v1445_v52 = vand.u32 127, %v162_v50 }
   0x4   :  { %s1333_s16 = smov 113   ;;  %s1334_s17 = smov 112   ;;  %v33_v49 = vld [vmem:[%s1685_s1 + $0x20] sm:$0xff] }
   0x5   :  { %s1335_s18 = smov 111   ;;  %v1254_v53 = vld [vmem:[%s1688_s6 + $0x1] ss:$8 sm:$0xf]  ;;  %vm196_vm2 = vcmp.lt.s32.totalorder %v1445_v52, 16  ;;  %vm164_vm3 = vcmp.lt.s32.totalorder %v1445_v52, 17 }
   0x6   :  { %v207_v54 = vperm.slane %v1254_v53, 3  ;;  %v206_v60 = vperm.slane %v1254_v53, 2  ;;  %v204_v61 = vperm.slane %v1254_v53, 0  ;;  %v205_v62 = vperm.slane %v1254_v53, 1  ;;  %v1255_v63 = vld [vmem:[%s1689_s3 + $0x2] sm:$0x3] }
   0x7   :  { %vm364_vm4 = vcmp.lt.s32.totalorder %v1445_v52, 15  ;;  %vm469_vm5 = vcmp.lt.s32.totalorder %v1445_v52, 1  ;;  %vm651_vm6 = vcmp.lt.s32.totalorder %v1445_v52, 127  ;;  %vm756_vm7 = vcmp.lt.s32.totalorder %v1445_v52, 113 }
   0x8   :  { %vm861_vm8 = vcmp.lt.s32.totalorder %v1445_v52, 112  ;;  %vm966_vm9 = vcmp.lt.s32.totalorder %v1445_v52, 111 }
   0xa   :  { %47 = vperm.xlu0 %1323, %v30_v2  }
  0x74   :  { %v37_v6 = vpop.permute.xlu0 %36 }
  0x75   :  { %v41_v8 = vperm.slane %v37_v6, %v40_v7  ;;  %v79_v32 = vpop.permute.xlu1 %78 }
  0x77   :  { %v43_v12 = vmul.f32 %v41_v8, %v27_v9  ;;  %v44_v13 = vmul.f32 %v41_v8, %v28_v10 }
  0x7c   :  { %v48_v11 = vpop.permute.xlu0 %47 }
  0x7d   :  { %v52_v14 = vperm.slane %v48_v11, %v40_v7 }
  0x7f   :  { %v54_v15 = vadd.f32 %v52_v14, %v43_v12  ;;  %v55_v16 = vadd.f32 %v52_v14, %v44_v13 }
  0x81   :  { %v56_v17 = vmax.f32 %v54_v15, 0.0  ;;  %v57_v18 = vmax.f32 %v55_v16, 0.0 }
  0x83   :  { %61 = vst [vmem:[#allocation1] ss:$2 sm:$0xff] %v56_v17 }
  0x84   :  { %63 = vst [vmem:[#allocation1 + $0x10] ss:$2 sm:$0xff] %v57_v18 }
  0x8a   :  { %v64_v19 = vld.sshfl [vmem:[#allocation1] sm:$0xff pattern:$0x75316420]  ;;  %v65_v20 = vld.sshfl [vmem:[#allocation1 + $0x8] sm:$0xff pattern:$0x75316420] }
  0x8b   :  { %v72_v21 = vpack.c.bf16 %v64_v19, %v64_v19  ;;  %v73_v22 = vpack.c.bf16 %v65_v20, %v65_v20  ;;  %1084 = vst [vmem:[#allocation1] ss:$2 sm:$0xff] %v27_v9  ;;  %v66_v23 = vld.sshfl [vmem:[#allocation1 + $0x10] sm:$0xff pattern:$0x75316420] }
  0x8c   :  { %v74_v24 = vpack.c.bf16 %v66_v23, %v66_v23  ;;  %v67_v25 = vld.sshfl [vmem:[#allocation1 + $0x18] sm:$0xff pattern:$0x75316420] }
  0x8d   :  { %v87_v26 = vsel %vm85_vm0, %v72_v21, 0  ;;  %v90_v27 = vsel %vm85_vm0, %v73_v22, 0  ;;  %v75_v28 = vpack.c.bf16 %v67_v25, %v67_v25  ;;  %1086 = vst [vmem:[#allocation1 + $0x10] ss:$2 sm:$0xff] %v28_v10 }
  0x8e   :  { %105 = vmatpush.bf16.msra.mxu0 %v87_v26  ;;  %118 = vmatpush.bf16.msra.mxu1 %v90_v27  ;;  %v93_v29 = vsel %vm85_vm0, %v74_v24, 0  ;;  %v169_v9 = vld [vmem:[%s1688_s6] ss:$8 sm:$0xf] }
  0x8f   :  { %131 = vmatpush.bf16.msra.mxu2 %v93_v29  ;;  %v96_v31 = vsel %vm85_vm0, %v75_v28, 0  ;;  %v173_v13 = vperm.slane %v169_v9, 2  ;;  %v174_v17 = vperm.slane %v169_v9, 3  ;;  %v1264_v25 = vld [vmem:[%s1688_s6 + $0x2] ss:$8 sm:$0xf] }
  0x90   :  { %144 = vmatpush.bf16.msra.mxu3 %v96_v31  ;;  %v373_v28 = vperm.slane %v1264_v25, 1  ;;  %v171_v29 = vperm.slane %v169_v9, 0 }
  0x91   :  { %1250 = vmatmul.msk.bf16.vlgmr.msra.gmra.mxu0 %vm81_vm1, %v58_v30  ;;  %1251 = vmatmul.msk.bf16.vlgmr.msra.gmra.mxu1 %vm81_vm1, %v58_v30 }
  0x92   :  { %1252 = vmatmul.msk.bf16.vlgmr.msra.gmra.mxu2 %vm81_vm1, %v58_v30 }
  0x93   :  { %1253 = vmatmul.msk.bf16.vlgmr.msra.gmra.mxu3 %vm81_vm1, %v58_v30 }
 0x10e   :  { %v107_v33 = vpop.f32.mrf.mxu0  ;;  %v120_v34 = vpop.f32.mrf.mxu1 }
 0x10f   :  { %v108_v35 = vadd.f32 %v107_v33, %v79_v32  ;;  %v121_v36 = vadd.f32 %v120_v34, %v79_v32  ;;  %v374_v33 = vperm.slane %v1264_v25, 2 }
 0x111   :  { %v1402_v37 = vmax.f32 %v108_v35, 0.0  ;;  %v1404_v38 = vmax.f32 %v121_v36, 0.0  ;;  %v183_v35 = vld [vmem:[%s1689_s3] sm:$0x3] }
 0x113   :  { %190 = vrot.lane.b32.xlu1 %v1404_v38, %s1328_s2  ;;  %188 = vrot.lane.b32.xlu0 %v1402_v37, %s1328_s2 }
 0x115   :  { %v133_v39 = vpop.f32.mrf.mxu2 }
 0x116   :  { %v134_v40 = vadd.f32 %v133_v39, %v79_v32  ;;  %v146_v41 = vpop.f32.mrf.mxu3  ;;  %v109_v42 = vpop.f32.mrf.mxu0 }
 0x117   :  { %v147_v43 = vadd.f32 %v146_v41, %v79_v32  ;;  %v122_v44 = vpop.f32.mrf.mxu1  ;;  %v172_v32 = vperm.slane %v169_v9, 1 }
 0x118   :  { %v1408_v45 = vmax.f32 %v134_v40, 0.0 }
 0x119   :  { %v1410_v46 = vmax.f32 %v147_v43, 0.0 }
 0x11a   :  { %192 = vrot.lane.b32.xlu2 %v1408_v45, %s1328_s2 }
 0x11b   :  { %156 = vrot.lane.b32.xlu1 %v1404_v38, %s1329_s12  ;;  %160 = vrot.lane.b32.xlu0 %v1410_v46, %s1329_s12 }
 0x11d   :  { %v135_v47 = vpop.f32.mrf.mxu2 }
 0x11e   :  { %v148_v48 = vpop.f32.mrf.mxu3 }
 0x122   :  { %194 = vrot.lane.b32.xlu2 %v1410_v46, %s1328_s2 }
 0x123   :  { %154 = vrot.lane.b32.xlu1 %v1402_v37, %s1329_s12  ;;  %360 = vrot.lane.b32.xlu0 %v1408_v45, %s1330_s13 }
 0x12a   :  { %158 = vrot.lane.b32.xlu2 %v1408_v45, %s1329_s12 }
 0x12b   :  { %362 = vrot.lane.b32.xlu1 %v1410_v46, %s1330_s13  ;;  %463 = vrot.lane.b32.xlu0 %v1404_v38, %s1331_s14 }
 0x132   :  { %358 = vrot.lane.b32.xlu2 %v1404_v38, %s1330_s13 }
 0x133   :  { %465 = vrot.lane.b32.xlu1 %v1408_v45, %s1331_s14  ;;  %461 = vrot.lane.b32.xlu0 %v1402_v37, %s1331_s14 }
 0x13a   :  { %356 = vrot.lane.b32.xlu2 %v1402_v37, %s1330_s13 }
 0x13b   :  { %643 = vrot.lane.b32.xlu1 %v1402_v37, %s1332_s15  ;;  %649 = vrot.lane.b32.xlu0 %v1410_v46, %s1332_s15 }
 0x142   :  { %467 = vrot.lane.b32.xlu2 %v1410_v46, %s1331_s14 }
 0x143   :  { %645 = vrot.lane.b32.xlu1 %v1404_v38, %s1332_s15  ;;  %752 = vrot.lane.b32.xlu0 %v1408_v45, %s1333_s16 }
 0x14a   :  { %647 = vrot.lane.b32.xlu2 %v1408_v45, %s1332_s15 }
 0x14b   :  { %754 = vrot.lane.b32.xlu1 %v1410_v46, %s1333_s16  ;;  %853 = vrot.lane.b32.xlu0 %v1402_v37, %s1334_s17 }
 0x152   :  { %748 = vrot.lane.b32.xlu2 %v1402_v37, %s1333_s16 }
 0x153   :  { %857 = vrot.lane.b32.xlu1 %v1408_v45, %s1334_s17  ;;  %855 = vrot.lane.b32.xlu0 %v1404_v38, %s1334_s17 }
 0x15a   :  { %750 = vrot.lane.b32.xlu2 %v1404_v38, %s1333_s16 }
 0x15b   :  { %958 = vrot.lane.b32.xlu1 %v1402_v37, %s1335_s18  ;;  %964 = vrot.lane.b32.xlu0 %v1410_v46, %s1335_s18 }
 0x162   :  { %859 = vrot.lane.b32.xlu2 %v1410_v46, %s1334_s17 }
 0x163   :  { %960 = vrot.lane.b32.xlu1 %v1404_v38, %s1335_s18  ;;  %1235 = vperm.xlu0 %1323, %v33_v49  }
 0x16a   :  { %962 = vrot.lane.b32.xlu2 %v1408_v45, %s1335_s18 }
 0x174   :  { %v193_v51 = vpop.permute.xlu2 %192 }
 0x17c   :  { %v195_v55 = vpop.permute.xlu2 %194 }
 0x17d   :  { %v197_v56 = vsel %vm196_vm2, %v193_v51, %v195_v55 }
 0x17e   :  { %v215_v57 = vmul.f32 %v207_v54, %v197_v56 }
 0x180   :  { %v221_v58 = vpack.c.bf16 %v215_v57, %v215_v57 }
 0x182   :  { %v235_v59 = vsel %vm85_vm0, %v221_v58, 0 }
 0x183   :  { %283 = vmatpush.bf16.msrb.mxu3 %v235_v59  ;;  %v375_v59 = vperm.slane %v1264_v25, 3 }
 0x184   :  { %v159_v0 = vpop.permute.xlu2 %158 }
 0x185   :  { %v191_v1 = vpop.permute.xlu1 %190  ;;  %v189_v2 = vpop.permute.xlu0 %188 }
 0x186   :  { %v198_v3 = vsel %vm196_vm2, %v191_v1, %v193_v51  ;;  %v199_v4 = vsel %vm196_vm2, %v189_v2, %v191_v1  ;;  %v200_v5 = vsel %vm196_vm2, %v195_v55, %v189_v2  ;;  %1259 = vmatmul.msk.bf16.vlgmr.msrb.gmra.mxu3 %vm81_vm1, %v1255_v63  ;;  %v372_v55 = vperm.slane %v1264_v25, 0 }
 0x187   :  { %v214_v6 = vmul.f32 %v206_v60, %v198_v3  ;;  %v212_v7 = vmul.f32 %v204_v61, %v200_v5  ;;  %v213_v8 = vmul.f32 %v205_v62, %v199_v4  ;;  %v1270_v3 = vld [vmem:[%s1688_s6 + $0x3] ss:$8 sm:$0xf]  ;;  %v571_v25 = vpack.c.bf16 %v1410_v46, %v1410_v46 }
 0x188   :  { %v569_v46 = vpack.c.bf16 %v1404_v38, %v1404_v38 }
 0x189   :  { %v218_v10 = vpack.c.bf16 %v212_v7, %v212_v7  ;;  %v219_v11 = vpack.c.bf16 %v213_v8, %v213_v8  ;;  %v220_v12 = vpack.c.bf16 %v214_v6, %v214_v6  ;;  %v479_v7 = vperm.slane %v1270_v3, 2 }
 0x18a   :  { %v480_v8 = vperm.slane %v1270_v3, 3 }
 0x18b   :  { %v226_v14 = vsel %vm85_vm0, %v218_v10, 0  ;;  %v229_v15 = vsel %vm85_vm0, %v219_v11, 0  ;;  %v232_v16 = vsel %vm85_vm0, %v220_v12, 0  ;;  %v477_v11 = vperm.slane %v1270_v3, 0 }
 0x18c   :  { %v359_v18 = vpop.permute.xlu2 %358  ;;  %244 = vmatpush.bf16.msrb.mxu0 %v226_v14  ;;  %257 = vmatpush.bf16.msrb.mxu1 %v229_v15  ;;  %v478_v12 = vperm.slane %v1270_v3, 1 }
 0x18d   :  { %270 = vmatpush.bf16.msrb.mxu2 %v232_v16  ;;  %v157_v19 = vpop.permute.xlu1 %156  ;;  %v161_v20 = vpop.permute.xlu0 %160 }
 0x18e   :  { %v166_v21 = vsel %vm164_vm3, %v157_v19, %v159_v0  ;;  %v165_v22 = vsel %vm164_vm3, %v159_v0, %v161_v20 }
 0x18f   :  { %v181_v23 = vmul.f32 %v173_v13, %v166_v21  ;;  %v182_v24 = vmul.f32 %v174_v17, %v165_v22  ;;  %1256 = vmatmul.msk.bf16.vlgmr.msrb.gmra.mxu0 %vm81_vm1, %v1255_v63  ;;  %1257 = vmatmul.msk.bf16.vlgmr.msrb.gmra.mxu1 %vm81_vm1, %v1255_v63  ;;  %v1265_v13 = vld [vmem:[%s1689_s3 + $0x4] sm:$0x3] }
 0x190   :  { %1258 = vmatmul.msk.bf16.vlgmr.msrb.gmra.mxu2 %vm81_vm1, %v1255_v63 }
 0x191   :  { %v186_v26 = vpack.c.bf16 %v181_v23, %v181_v23  ;;  %v187_v27 = vpack.c.bf16 %v182_v24, %v182_v24  ;;  %v1281_v24 = vld [vmem:[%s1688_s6 + $0x5] ss:$8 sm:$0xf] }
 0x193   :  { %v299_v30 = vsel %vm85_vm0, %v186_v26, 0  ;;  %v302_v31 = vsel %vm85_vm0, %v187_v27, 0 }
 0x194   :  { %v357_v34 = vpop.permute.xlu2 %356  ;;  %337 = vmatpush.bf16.msra.mxu2 %v299_v30  ;;  %350 = vmatpush.bf16.msra.mxu3 %v302_v31  ;;  %v662_v30 = vperm.slane %v1281_v24, 3  ;;  %v568_v31 = vpack.c.bf16 %v1402_v37, %v1402_v37 }
 0x195   :  { %v367_v36 = vsel %vm364_vm4, %v357_v34, %v359_v18  ;;  %v155_v39 = vpop.permute.xlu1 %154  ;;  %v361_v40 = vpop.permute.xlu0 %360 }
 0x196   :  { %v381_v41 = vmul.f32 %v373_v28, %v367_v36  ;;  %v167_v42 = vsel %vm164_vm3, %v155_v39, %v157_v19  ;;  %v168_v43 = vsel %vm164_vm3, %v161_v20, %v155_v39  ;;  %v366_v44 = vsel %vm364_vm4, %v359_v18, %v361_v40 }
 0x197   :  { %v179_v47 = vmul.f32 %v171_v29, %v168_v43  ;;  %v180_v48 = vmul.f32 %v172_v32, %v167_v42  ;;  %v382_v49 = vmul.f32 %v374_v33, %v366_v44  ;;  %1263 = vmatmul.msk.bf16.vlgmr.msra.gmra.mxu3 %vm81_vm1, %v183_v35  ;;  %v570_v39 = vpack.c.bf16 %v1408_v45, %v1408_v45 }
 0x198   :  { %v387_v50 = vpack.c.bf16 %v381_v41, %v381_v41  ;;  %v576_v38 = vsel %vm85_vm0, %v568_v31, 0  ;;  %v579_v45 = vsel %vm85_vm0, %v569_v46, 0 }
 0x199   :  { %v184_v51 = vpack.c.bf16 %v179_v47, %v179_v47  ;;  %v185_v53 = vpack.c.bf16 %v180_v48, %v180_v48  ;;  %v388_v54 = vpack.c.bf16 %v382_v49, %v382_v49  ;;  %v582_v44 = vsel %vm85_vm0, %v570_v39, 0 }
 0x19a   :  { %v397_v60 = vsel %vm85_vm0, %v387_v50, 0  ;;  %v659_v48 = vperm.slane %v1281_v24, 0  ;;  %v661_v49 = vperm.slane %v1281_v24, 2  ;;  %v660_v50 = vperm.slane %v1281_v24, 1 }
 0x19b   :  { %v293_v56 = vsel %vm85_vm0, %v184_v51, 0  ;;  %v296_v57 = vsel %vm85_vm0, %v185_v53, 0  ;;  %v400_v58 = vsel %vm85_vm0, %v388_v54, 0  ;;  %v1271_v51 = vld [vmem:[%s1689_s3 + $0x6] sm:$0x3] }
 0x19c   :  { %311 = vmatpush.bf16.msra.mxu0 %v293_v56  ;;  %324 = vmatpush.bf16.msra.mxu1 %v296_v57  ;;  %v468_v6 = vpop.permute.xlu2 %467  ;;  %v1293_v24 = vld [vmem:[%s1688_s6 + $0x7] ss:$8 sm:$0xf] }
 0x19d   :  { %438 = vmatpush.bf16.msrb.mxu2 %v400_v58  ;;  %v363_v61 = vpop.permute.xlu1 %362  ;;  %v464_v62 = vpop.permute.xlu0 %463  ;;  %v869_v39 = vperm.slane %v1293_v24, 0 }
 0x19e   :  { %v365_v63 = vsel %vm364_vm4, %v361_v40, %v363_v61  ;;  %v368_v0 = vsel %vm364_vm4, %v363_v61, %v357_v34  ;;  %v585_v40 = vsel %vm85_vm0, %v571_v25, 0 }
 0x19f   :  { %v380_v1 = vmul.f32 %v372_v55, %v368_v0  ;;  %v383_v2 = vmul.f32 %v375_v59, %v365_v63  ;;  %1260 = vmatmul.msk.bf16.vlgmr.msra.gmra.mxu0 %vm81_vm1, %v183_v35  ;;  %1261 = vmatmul.msk.bf16.vlgmr.msra.gmra.mxu1 %vm81_vm1, %v183_v35 }
 0x1a0   :  { %425 = vmatpush.bf16.msrb.mxu1 %v397_v60  ;;  %1262 = vmatmul.msk.bf16.vlgmr.msra.gmra.mxu2 %vm81_vm1, %v183_v35 }
 0x1a1   :  { %v386_v4 = vpack.c.bf16 %v380_v1, %v380_v1  ;;  %v389_v5 = vpack.c.bf16 %v383_v2, %v383_v2 }
 0x1a3   :  { %v394_v9 = vsel %vm85_vm0, %v386_v4, 0  ;;  %v403_v10 = vsel %vm85_vm0, %v389_v5, 0 }
 0x1a4   :  { %412 = vmatpush.bf16.msrb.mxu0 %v394_v9  ;;  %451 = vmatpush.bf16.msrb.mxu3 %v403_v10  ;;  %v648_v36 = vpop.permute.xlu2 %647 }
 0x1a5   :  { %v466_v14 = vpop.permute.xlu1 %465  ;;  %v462_v15 = vpop.permute.xlu0 %461 }
 0x1a6   :  { %v470_v16 = vsel %vm469_vm5, %v466_v14, %v468_v6  ;;  %v471_v17 = vsel %vm469_vm5, %v464_v62, %v466_v14  ;;  %v472_v18 = vsel %vm469_vm5, %v462_v15, %v464_v62  ;;  %v473_v19 = vsel %vm469_vm5, %v468_v6, %v462_v15  ;;  %v1287_v62 = vld [vmem:[%s1688_s6 + $0x6] ss:$8 sm:$0xf] }
 0x1a7   :  { %v487_v20 = vmul.f32 %v479_v7, %v471_v17  ;;  %v488_v21 = vmul.f32 %v480_v8, %v470_v16  ;;  %v485_v22 = vmul.f32 %v477_v11, %v473_v19  ;;  %v486_v23 = vmul.f32 %v478_v12, %v472_v18  ;;  %1269 = vmatmul.msk.bf16.vlgmr.msrb.gmra.mxu3 %vm81_vm1, %v1265_v13  ;;  %v1276_v16 = vld [vmem:[%s1689_s3 + $0x8] sm:$0x3] }
 0x1a8   :  { %v767_v1 = vperm.slane %v1287_v62, 3  ;;  %v764_v11 = vperm.slane %v1287_v62, 0  ;;  %v765_v14 = vperm.slane %v1287_v62, 1  ;;  %v766_v15 = vperm.slane %v1287_v62, 2 }
 0x1a9   :  { %v493_v26 = vpack.c.bf16 %v487_v20, %v487_v20  ;;  %v494_v27 = vpack.c.bf16 %v488_v21, %v488_v21  ;;  %v491_v28 = vpack.c.bf16 %v485_v22, %v485_v22  ;;  %v492_v29 = vpack.c.bf16 %v486_v23, %v486_v23 }
 0x1ab   :  { %v499_v32 = vsel %vm85_vm0, %v491_v28, 0  ;;  %v502_v33 = vsel %vm85_vm0, %v492_v29, 0  ;;  %v505_v34 = vsel %vm85_vm0, %v493_v26, 0  ;;  %v508_v35 = vsel %vm85_vm0, %v494_v27, 0 }
 0x1ac   :  { %517 = vmatpush.bf16.msra.mxu0 %v499_v32  ;;  %530 = vmatpush.bf16.msra.mxu1 %v502_v33  ;;  %v749_v57 = vpop.permute.xlu2 %748  ;;  %v872_v27 = vperm.slane %v1293_v24, 3 }
 0x1ad   :  { %543 = vmatpush.bf16.msra.mxu2 %v505_v34  ;;  %556 = vmatpush.bf16.msra.mxu3 %v508_v35  ;;  %v644_v37 = vpop.permute.xlu1 %643  ;;  %v650_v41 = vpop.permute.xlu0 %649 }
 0x1ae   :  { %v655_v42 = vsel %vm651_vm6, %v650_v41, %v644_v37  ;;  %v652_v53 = vsel %vm651_vm6, %v648_v36, %v650_v41 }
 0x1af   :  { %v670_v43 = vmul.f32 %v662_v30, %v655_v42  ;;  %1266 = vmatmul.msk.bf16.vlgmr.msrb.gmra.mxu0 %vm81_vm1, %v1265_v13  ;;  %1267 = vmatmul.msk.bf16.vlgmr.msrb.gmra.mxu1 %vm81_vm1, %v1265_v13  ;;  %v669_v60 = vmul.f32 %v661_v49, %v652_v53  ;;  %v1282_v42 = vld [vmem:[%s1689_s3 + $0xa] sm:$0x3] }
 0x1b0   :  { %1268 = vmatmul.msk.bf16.vlgmr.msrb.gmra.mxu2 %vm81_vm1, %v1265_v13  ;;  %594 = vmatpush.bf16.msrb.mxu0 %v576_v38 }
 0x1b1   :  { %633 = vmatpush.bf16.msrb.mxu3 %v585_v40  ;;  %607 = vmatpush.bf16.msrb.mxu1 %v579_v45  ;;  %v676_v47 = vpack.c.bf16 %v670_v43, %v670_v43  ;;  %v675_v2 = vpack.c.bf16 %v669_v60, %v669_v60  ;;  %v870_v40 = vperm.slane %v1293_v24, 1 }
 0x1b2   :  { %620 = vmatpush.bf16.msrb.mxu2 %v582_v44 }
 0x1b3   :  { %v690_v59 = vsel %vm85_vm0, %v676_v47, 0  ;;  %v687_v9 = vsel %vm85_vm0, %v675_v2, 0 }
 0x1b4   :  { %v751_v10 = vpop.permute.xlu2 %750 }
 0x1b5   :  { %v646_v54 = vpop.permute.xlu1 %645  ;;  %v753_v0 = vpop.permute.xlu0 %752  ;;  %v759_v13 = vsel %vm756_vm7, %v749_v57, %v751_v10 }
 0x1b6   :  { %v653_v55 = vsel %vm651_vm6, %v646_v54, %v648_v36  ;;  %v654_v56 = vsel %vm651_vm6, %v644_v37, %v646_v54  ;;  %v758_v17 = vsel %vm756_vm7, %v751_v10, %v753_v0  ;;  %v772_v20 = vmul.f32 %v764_v11, %v759_v13 }
 0x1b7   :  { %v667_v58 = vmul.f32 %v659_v48, %v654_v56  ;;  %1275 = vmatmul.msk.bf16.vlgmr.msra.gmra.mxu3 %vm81_vm1, %v1271_v51  ;;  %v668_v61 = vmul.f32 %v660_v50, %v653_v55  ;;  %v773_v22 = vmul.f32 %v765_v14, %v758_v17  ;;  %v871_v37 = vperm.slane %v1293_v24, 2  ;;  %v1299_v50 = vld [vmem:[%s1688_s6 + $0x20] ss:$8 sm:$0xf]  ;;  %v1294_v17 = vld [vmem:[%s1689_s3 + $0xe] sm:$0x3] }
 0x1b8   :  { %738 = vmatpush.bf16.msra.mxu3 %v690_v59  ;;  %v778_v25 = vpack.c.bf16 %v772_v20, %v772_v20  ;;  %v977_v54 = vperm.slane %v1299_v50, 3  ;;  %v976_v2 = vperm.slane %v1299_v50, 2 }
 0x1b9   :  { %v673_v63 = vpack.c.bf16 %v667_v58, %v667_v58  ;;  %v674_v3 = vpack.c.bf16 %v668_v61, %v668_v61  ;;  %v779_v28 = vpack.c.bf16 %v773_v22, %v773_v22  ;;  %v32_v22 = vld [vmem:[%s1685_s1 + $0x18] sm:$0xf] }
 0x1ba   :  { %v786_v34 = vsel %vm85_vm0, %v778_v25, 0  ;;  %1065 = vperm.xlu2 %1325, %v32_v22  }
 0x1bb   :  { %v681_v7 = vsel %vm85_vm0, %v673_v63, 0  ;;  %v684_v8 = vsel %vm85_vm0, %v674_v3, 0  ;;  %v789_v35 = vsel %vm85_vm0, %v779_v28, 0  ;;  %v975_v3 = vperm.slane %v1299_v50, 1 }
 0x1bc   :  { %v860_v26 = vpop.permute.xlu2 %859 }
 0x1bd   :  { %v755_v4 = vpop.permute.xlu1 %754  ;;  %v854_v19 = vpop.permute.xlu0 %853 }
 0x1be   :  { %v760_v5 = vsel %vm756_vm7, %v755_v4, %v749_v57  ;;  %v757_v18 = vsel %vm756_vm7, %v753_v0, %v755_v4  ;;  %v865_v30 = vsel %vm861_vm8, %v860_v26, %v854_v19  ;;  %v974_v0 = vperm.slane %v1299_v50, 0 }
 0x1bf   :  { %v775_v6 = vmul.f32 %v767_v1, %v760_v5  ;;  %1272 = vmatmul.msk.bf16.vlgmr.msra.gmra.mxu0 %vm81_vm1, %v1271_v51  ;;  %1273 = vmatmul.msk.bf16.vlgmr.msra.gmra.mxu1 %vm81_vm1, %v1271_v51  ;;  %v774_v23 = vmul.f32 %v766_v15, %v757_v18  ;;  %v880_v32 = vmul.f32 %v872_v27, %v865_v30  ;;  %v1288_v5 = vld [vmem:[%s1689_s3 + $0xc] sm:$0x3]  ;;  %v1300_v18 = vld [vmem:[%s1689_s3 + $0x10] sm:$0x3] }
 0x1c0   :  { %1274 = vmatmul.msk.bf16.vlgmr.msra.gmra.mxu2 %vm81_vm1, %v1271_v51  ;;  %699 = vmatpush.bf16.msra.mxu0 %v681_v7 }
 0x1c1   :  { %712 = vmatpush.bf16.msra.mxu1 %v684_v8  ;;  %725 = vmatpush.bf16.msra.mxu2 %v687_v9  ;;  %v781_v12 = vpack.c.bf16 %v775_v6, %v775_v6  ;;  %v780_v29 = vpack.c.bf16 %v774_v23, %v774_v23  ;;  %v886_v46 = vpack.c.bf16 %v880_v32, %v880_v32 }
 0x1c3   :  { %v795_v21 = vsel %vm85_vm0, %v781_v12, 0  ;;  %v792_v36 = vsel %vm85_vm0, %v780_v29, 0  ;;  %v900_v47 = vsel %vm85_vm0, %v886_v46, 0 }
 0x1c4   :  { %v963_v1 = vpop.permute.xlu2 %962 }
 0x1c5   :  { %v858_v31 = vpop.permute.xlu1 %857  ;;  %v856_v33 = vpop.permute.xlu0 %855 }
 0x1c6   :  { %v864_v41 = vsel %vm861_vm8, %v854_v19, %v856_v33  ;;  %v862_v43 = vsel %vm861_vm8, %v858_v31, %v860_v26  ;;  %v863_v38 = vsel %vm861_vm8, %v856_v33, %v858_v31 }
 0x1c7   :  { %1280 = vmatmul.msk.bf16.vlgmr.msrb.gmra.mxu3 %vm81_vm1, %v1276_v16  ;;  %v877_v45 = vmul.f32 %v869_v39, %v864_v41  ;;  %v879_v48 = vmul.f32 %v871_v37, %v862_v43  ;;  %v878_v49 = vmul.f32 %v870_v40, %v863_v38 }
 0x1c8   :  { %843 = vmatpush.bf16.msrb.mxu3 %v795_v21 }
 0x1c9   :  { %v883_v53 = vpack.c.bf16 %v877_v45, %v877_v45  ;;  %v885_v55 = vpack.c.bf16 %v879_v48, %v879_v48  ;;  %v884_v56 = vpack.c.bf16 %v878_v49, %v878_v49 }
 0x1cb   :  { %v891_v59 = vsel %vm85_vm0, %v883_v53, 0  ;;  %v894_v60 = vsel %vm85_vm0, %v884_v56, 0  ;;  %v897_v61 = vsel %vm85_vm0, %v885_v55, 0 }
 0x1cd   :  { %v959_v44 = vpop.permute.xlu1 %958  ;;  %v965_v51 = vpop.permute.xlu0 %964 }
 0x1ce   :  { %v970_v57 = vsel %vm966_vm9, %v965_v51, %v959_v44  ;;  %v967_v6 = vsel %vm966_vm9, %v963_v1, %v965_v51 }
 0x1cf   :  { %1277 = vmatmul.msk.bf16.vlgmr.msrb.gmra.mxu0 %vm81_vm1, %v1276_v16  ;;  %1278 = vmatmul.msk.bf16.vlgmr.msrb.gmra.mxu1 %vm81_vm1, %v1276_v16  ;;  %v985_v58 = vmul.f32 %v977_v54, %v970_v57  ;;  %v984_v10 = vmul.f32 %v976_v2, %v967_v6 }
 0x1d0   :  { %1279 = vmatmul.msk.bf16.vlgmr.msrb.gmra.mxu2 %vm81_vm1, %v1276_v16  ;;  %804 = vmatpush.bf16.msrb.mxu0 %v786_v34 }
 0x1d1   :  { %817 = vmatpush.bf16.msrb.mxu1 %v789_v35  ;;  %830 = vmatpush.bf16.msrb.mxu2 %v792_v36  ;;  %v991_v63 = vpack.c.bf16 %v985_v58, %v985_v58  ;;  %v990_v13 = vpack.c.bf16 %v984_v10, %v984_v10 }
 0x1d3   :  { %v1005_v9 = vsel %vm85_vm0, %v991_v63, 0  ;;  %v1002_v16 = vsel %vm85_vm0, %v990_v13, 0  ;;  %v1090_v13 = vld.sshfl [vmem:[#allocation1 + $0x18] sm:$0xff pattern:$0x75316420] }
 0x1d5   :  { %v961_v62 = vpop.permute.xlu1 %960 }
 0x1d6   :  { %v969_v4 = vsel %vm966_vm9, %v959_v44, %v961_v62  ;;  %v968_v7 = vsel %vm966_vm9, %v961_v62, %v963_v1 }
 0x1d7   :  { %1286 = vmatmul.msk.bf16.vlgmr.msra.gmra.mxu3 %vm81_vm1, %v1282_v42  ;;  %v982_v8 = vmul.f32 %v974_v0, %v969_v4  ;;  %v983_v11 = vmul.f32 %v975_v3, %v968_v7 }
 0x1d8   :  { %948 = vmatpush.bf16.msra.mxu3 %v900_v47 }
 0x1d9   :  { %v988_v12 = vpack.c.bf16 %v982_v8, %v982_v8  ;;  %v989_v14 = vpack.c.bf16 %v983_v11, %v983_v11 }
 0x1db   :  { %v996_v15 = vsel %vm85_vm0, %v988_v12, 0  ;;  %v999_v52 = vsel %vm85_vm0, %v989_v14, 0  ;;  %v1089_v14 = vld.sshfl [vmem:[#allocation1 + $0x10] sm:$0xff pattern:$0x75316420] }
 0x1df   :  { %1283 = vmatmul.msk.bf16.vlgmr.msra.gmra.mxu0 %vm81_vm1, %v1282_v42  ;;  %1284 = vmatmul.msk.bf16.vlgmr.msra.gmra.mxu1 %vm81_vm1, %v1282_v42 }
 0x1e0   :  { %1285 = vmatmul.msk.bf16.vlgmr.msra.gmra.mxu2 %vm81_vm1, %v1282_v42  ;;  %909 = vmatpush.bf16.msra.mxu0 %v891_v59 }
 0x1e1   :  { %922 = vmatpush.bf16.msra.mxu1 %v894_v60  ;;  %935 = vmatpush.bf16.msra.mxu2 %v897_v61 }
 0x1e7   :  { %1292 = vmatmul.msk.bf16.vlgmr.msrb.gmra.mxu3 %vm81_vm1, %v1288_v5 }
 0x1e8   :  { %1053 = vmatpush.bf16.msrb.mxu3 %v1005_v9 }
 0x1ef   :  { %1289 = vmatmul.msk.bf16.vlgmr.msrb.gmra.mxu0 %vm81_vm1, %v1288_v5  ;;  %1290 = vmatmul.msk.bf16.vlgmr.msrb.gmra.mxu1 %vm81_vm1, %v1288_v5 }
 0x1f0   :  { %1291 = vmatmul.msk.bf16.vlgmr.msrb.gmra.mxu2 %vm81_vm1, %v1288_v5  ;;  %1014 = vmatpush.bf16.msrb.mxu0 %v996_v15 }
 0x1f1   :  { %1027 = vmatpush.bf16.msrb.mxu1 %v999_v52  ;;  %1040 = vmatpush.bf16.msrb.mxu2 %v1002_v16  ;;  %v1098_v52 = vpack.c.bf16 %v1090_v13, %v1090_v13  ;;  %v1097_v16 = vpack.c.bf16 %v1089_v14, %v1089_v14 }
 0x1f7   :  { %1298 = vmatmul.msk.bf16.vlgmr.msra.gmra.mxu3 %vm81_vm1, %v1294_v17 }
 0x1ff   :  { %1295 = vmatmul.msk.bf16.vlgmr.msra.gmra.mxu0 %vm81_vm1, %v1294_v17  ;;  %1296 = vmatmul.msk.bf16.vlgmr.msra.gmra.mxu1 %vm81_vm1, %v1294_v17 }
 0x200   :  { %1297 = vmatmul.msk.bf16.vlgmr.msra.gmra.mxu2 %vm81_vm1, %v1294_v17 }
 0x207   :  { %1304 = vmatmul.msk.bf16.vlgmr.msrb.gmra.mxu3 %vm81_vm1, %v1300_v18 }
 0x209   :  { %v285_v19 = vpop.f32.mrf.mxu3 }
 0x20c   :  { %v246_v20 = vpop.f32.mrf.mxu0  ;;  %v259_v21 = vpop.f32.mrf.mxu1 }
 0x20f   :  { %1301 = vmatmul.msk.bf16.vlgmr.msrb.gmra.mxu0 %vm81_vm1, %v1300_v18  ;;  %1302 = vmatmul.msk.bf16.vlgmr.msrb.gmra.mxu1 %vm81_vm1, %v1300_v18 }
 0x210   :  { %1303 = vmatmul.msk.bf16.vlgmr.msrb.gmra.mxu2 %vm81_vm1, %v1300_v18 }
 0x211   :  { %v287_v23 = vpop.f32.mrf.mxu3 }
 0x213   :  { %v272_v24 = vpop.f32.mrf.mxu2 }
 0x214   :  { %v248_v25 = vpop.f32.mrf.mxu0  ;;  %v261_v26 = vpop.f32.mrf.mxu1 }
 0x215   :  { %v1081_v25 = vld [vmem:[%s1690_s5] sm:$0xf] }
 0x21a   :  { %v352_v27 = vpop.f32.mrf.mxu3 }
 0x21b   :  { %v274_v28 = vpop.f32.mrf.mxu2  ;;  %v353_v29 = vadd.f32 %v352_v27, %v285_v19  ;;  %v1087_v19 = vld.sshfl [vmem:[#allocation1] sm:$0xff pattern:$0x75316420] }
 0x21c   :  { %v313_v30 = vpop.f32.mrf.mxu0  ;;  %v326_v31 = vpop.f32.mrf.mxu1  ;;  %v1095_v22 = vpack.c.bf16 %v1087_v19, %v1087_v19 }
 0x21d   :  { %v314_v32 = vadd.f32 %v313_v30, %v246_v20  ;;  %v327_v33 = vadd.f32 %v326_v31, %v259_v21  ;;  %v1088_v20 = vld.sshfl [vmem:[#allocation1 + $0x8] sm:$0xff pattern:$0x75316420]  ;;  %v1112_v21 = vsel %vm85_vm0, %v1098_v52, 0 }
 0x21e   :  { %v1096_v23 = vpack.c.bf16 %v1088_v20, %v1088_v20  ;;  %1160 = vmatpush.bf16.msra.mxu3 %v1112_v21  ;;  %v1103_v26 = vsel %vm85_vm0, %v1095_v22, 0 }
 0x21f   :  { %1121 = vmatpush.bf16.msra.mxu0 %v1103_v26 }
 0x220   :  { %v1106_v27 = vsel %vm85_vm0, %v1096_v23, 0 }
 0x221   :  { %1134 = vmatpush.bf16.msra.mxu1 %v1106_v27  ;;  %1308 = vmatmul.msk.bf16.vlgmr.msra.gmra.mxu3 %vm81_vm1, %v1081_v25 }
 0x222   :  { %v354_v34 = vpop.f32.mrf.mxu3  ;;  %1305 = vmatmul.msk.bf16.vlgmr.msra.gmra.mxu0 %vm81_vm1, %v1081_v25 }
 0x223   :  { %v339_v35 = vpop.f32.mrf.mxu2 }
 0x224   :  { %v340_v36 = vadd.f32 %v339_v35, %v272_v24  ;;  %v315_v46 = vpop.f32.mrf.mxu0  ;;  %v328_v39 = vpop.f32.mrf.mxu1  ;;  %v1109_v24 = vsel %vm85_vm0, %v1097_v16, 0  ;;  %1306 = vmatmul.msk.bf16.vlgmr.msra.gmra.mxu1 %vm81_vm1, %v1081_v25 }
 0x225   :  { %1147 = vmatpush.bf16.msra.mxu2 %v1109_v24 }
 0x228   :  { %1307 = vmatmul.msk.bf16.vlgmr.msra.gmra.mxu2 %vm81_vm1, %v1081_v25 }
 0x22a   :  { %v453_v37 = vpop.f32.mrf.mxu3 }
 0x22b   :  { %v341_v40 = vpop.f32.mrf.mxu2  ;;  %v460_v41 = vadd.f32 %v453_v37, %v353_v29 }
 0x22c   :  { %v414_v42 = vpop.f32.mrf.mxu0  ;;  %v427_v43 = vpop.f32.mrf.mxu1 }
 0x22d   :  { %v457_v38 = vadd.f32 %v414_v42, %v314_v32  ;;  %v458_v45 = vadd.f32 %v427_v43, %v327_v33 }
 0x232   :  { %v455_v44 = vpop.f32.mrf.mxu3 }
 0x233   :  { %v440_v47 = vpop.f32.mrf.mxu2 }
 0x234   :  { %v459_v48 = vadd.f32 %v440_v47, %v340_v36  ;;  %v416_v49 = vpop.f32.mrf.mxu0  ;;  %v429_v50 = vpop.f32.mrf.mxu1 }
 0x23a   :  { %v558_v51 = vpop.f32.mrf.mxu3 }
 0x23b   :  { %v442_v53 = vpop.f32.mrf.mxu2  ;;  %v565_v54 = vadd.f32 %v558_v51, %v460_v41 }
 0x23c   :  { %v519_v55 = vpop.f32.mrf.mxu0  ;;  %v532_v56 = vpop.f32.mrf.mxu1 }
 0x23d   :  { %v562_v57 = vadd.f32 %v519_v55, %v457_v38  ;;  %v563_v58 = vadd.f32 %v532_v56, %v458_v45 }
 0x242   :  { %v560_v59 = vpop.f32.mrf.mxu3 }
 0x243   :  { %v545_v60 = vpop.f32.mrf.mxu2  ;;  %v1066_v59 = vpop.permute.xlu2 %1065 }
 0x244   :  { %v1645_v61 = vadd.f32 %v545_v60, %v459_v48  ;;  %v521_v62 = vpop.f32.mrf.mxu0  ;;  %v534_v63 = vpop.f32.mrf.mxu1 }
 0x24a   :  { %v635_v0 = vpop.f32.mrf.mxu3 }
 0x24b   :  { %v547_v1 = vpop.f32.mrf.mxu2  ;;  %v642_v41 = vadd.f32 %v635_v0, %v565_v54 }
 0x24c   :  { %v596_v2 = vpop.f32.mrf.mxu0  ;;  %v609_v3 = vpop.f32.mrf.mxu1 }
 0x24d   :  { %v639_v45 = vadd.f32 %v596_v2, %v562_v57  ;;  %v640_v44 = vadd.f32 %v609_v3, %v563_v58 }
 0x252   :  { %v637_v4 = vpop.f32.mrf.mxu3 }
 0x253   :  { %v1647_v5 = vpop.f32.mrf.mxu2 }
 0x254   :  { %v598_v6 = vpop.f32.mrf.mxu0  ;;  %v611_v7 = vpop.f32.mrf.mxu1  ;;  %v641_v54 = vadd.f32 %v1647_v5, %v1645_v61 }
 0x25a   :  { %v740_v8 = vpop.f32.mrf.mxu3 }
 0x25b   :  { %v624_v9 = vpop.f32.mrf.mxu2  ;;  %v747_v47 = vadd.f32 %v740_v8, %v642_v41 }
 0x25c   :  { %v701_v10 = vpop.f32.mrf.mxu0  ;;  %v714_v11 = vpop.f32.mrf.mxu1 }
 0x25d   :  { %v744_v48 = vadd.f32 %v701_v10, %v639_v45  ;;  %v745_v49 = vadd.f32 %v714_v11, %v640_v44 }
 0x262   :  { %v742_v12 = vpop.f32.mrf.mxu3 }
 0x263   :  { %v727_v15 = vpop.f32.mrf.mxu2 }
 0x264   :  { %v703_v17 = vpop.f32.mrf.mxu0  ;;  %v716_v18 = vpop.f32.mrf.mxu1  ;;  %v746_v3 = vadd.f32 %v727_v15, %v641_v54  ;;  %v1076_v15 = vld [vmem:[%s1691_s4] sm:$0xf] }
 0x26a   :  { %v845_v28 = vpop.f32.mrf.mxu3 }
 0x26b   :  { %v729_v29 = vpop.f32.mrf.mxu2  ;;  %v852_v50 = vadd.f32 %v845_v28, %v747_v47 }
 0x26c   :  { %v806_v30 = vpop.f32.mrf.mxu0  ;;  %v819_v31 = vpop.f32.mrf.mxu1 }
 0x26d   :  { %v849_v51 = vadd.f32 %v806_v30, %v744_v48  ;;  %v850_v53 = vadd.f32 %v819_v31, %v745_v49 }
 0x272   :  { %v847_v32 = vpop.f32.mrf.mxu3 }
 0x273   :  { %v832_v33 = vpop.f32.mrf.mxu2 }
 0x274   :  { %v808_v34 = vpop.f32.mrf.mxu0  ;;  %v821_v35 = vpop.f32.mrf.mxu1  ;;  %v851_v9 = vadd.f32 %v832_v33, %v746_v3 }
 0x27a   :  { %v950_v36 = vpop.f32.mrf.mxu3 }
 0x27b   :  { %v834_v46 = vpop.f32.mrf.mxu2  ;;  %v957_v55 = vadd.f32 %v950_v36, %v852_v50 }
 0x27c   :  { %v911_v39 = vpop.f32.mrf.mxu0  ;;  %v924_v37 = vpop.f32.mrf.mxu1 }
 0x27d   :  { %v954_v60 = vadd.f32 %v911_v39, %v849_v51  ;;  %v955_v62 = vadd.f32 %v924_v37, %v850_v53  ;;  %v1236_v37 = vpop.permute.xlu0 %1235 }
 0x282   :  { %v952_v40 = vpop.f32.mrf.mxu3 }
 0x283   :  { %v937_v42 = vpop.f32.mrf.mxu2 }
 0x284   :  { %v913_v43 = vpop.f32.mrf.mxu0  ;;  %v926_v38 = vpop.f32.mrf.mxu1  ;;  %v956_v13 = vadd.f32 %v937_v42, %v851_v9 }
 0x28a   :  { %v1055_v56 = vpop.f32.mrf.mxu3 }
 0x28b   :  { %v939_v63 = vpop.f32.mrf.mxu2  ;;  %v1062_v1 = vadd.f32 %v1055_v56, %v957_v55 }
 0x28c   :  { %v1016_v0 = vpop.f32.mrf.mxu0  ;;  %v1029_v4 = vpop.f32.mrf.mxu1 }
 0x28d   :  { %v1071_v57 = vadd.f32 %v1066_v59, %v1062_v1  ;;  %v1059_v58 = vadd.f32 %v1016_v0, %v954_v60  ;;  %v1060_v2 = vadd.f32 %v1029_v4, %v955_v62 }
 0x28f   :  { %v1075_v6 = vmax.f32 %v1071_v57, 0.0  ;;  %v1068_v7 = vadd.f32 %v1066_v59, %v1059_v58  ;;  %v1069_v8 = vadd.f32 %v1066_v59, %v1060_v2 }
 0x291   :  { %v1080_v10 = vpack.c.bf16 %v1075_v6, %v1075_v6  ;;  %v1072_v11 = vmax.f32 %v1068_v7, 0.0  ;;  %v1073_v12 = vmax.f32 %v1069_v8, 0.0 }
 0x292   :  { %v1057_v14 = vpop.f32.mrf.mxu3 }
 0x293   :  { %v1077_v52 = vpack.c.bf16 %v1072_v11, %v1072_v11  ;;  %v1078_v16 = vpack.c.bf16 %v1073_v12, %v1073_v12  ;;  %v1042_v17 = vpop.f32.mrf.mxu2  ;;  %v1179_v61 = vsel %vm85_vm0, %v1080_v10, 0 }
 0x294   :  { %v1061_v5 = vadd.f32 %v1042_v17, %v956_v13  ;;  %1227 = vmatpush.bf16.msrb.mxu3 %v1179_v61  ;;  %v1018_v18 = vpop.f32.mrf.mxu0  ;;  %v1031_v19 = vpop.f32.mrf.mxu1 }
 0x295   :  { %v1170_v20 = vsel %vm85_vm0, %v1077_v52, 0  ;;  %v1173_v21 = vsel %vm85_vm0, %v1078_v16, 0 }
 0x296   :  { %v1070_v22 = vadd.f32 %v1066_v59, %v1061_v5  ;;  %1188 = vmatpush.bf16.msrb.mxu0 %v1170_v20  ;;  %1201 = vmatpush.bf16.msrb.mxu1 %v1173_v21 }
 0x297   :  { %1312 = vmatmul.msk.bf16.vlgmr.msrb.gmra.mxu3 %vm81_vm1, %v1076_v15 }
 0x298   :  { %v1074_v23 = vmax.f32 %v1070_v22, 0.0 }
 0x299   :  { %1309 = vmatmul.msk.bf16.vlgmr.msrb.gmra.mxu0 %vm81_vm1, %v1076_v15  ;;  %1310 = vmatmul.msk.bf16.vlgmr.msrb.gmra.mxu1 %vm81_vm1, %v1076_v15 }
 0x29a   :  { %v1079_v24 = vpack.c.bf16 %v1074_v23, %v1074_v23 }
 0x29b   :  { %v1044_v25 = vpop.f32.mrf.mxu2 }
 0x29c   :  { %v1176_v26 = vsel %vm85_vm0, %v1079_v24, 0 }
 0x29d   :  { %1214 = vmatpush.bf16.msrb.mxu2 %v1176_v26 }
 0x29f   :  { %v1123_v27 = vpop.f32.mrf.mxu0 }
 0x2a0   :  { %1311 = vmatmul.msk.bf16.vlgmr.msrb.gmra.mxu2 %vm81_vm1, %v1076_v15 }
 0x2a1   :  { %v1136_v28 = vpop.f32.mrf.mxu1 }
 0x2a4   :  { %v1162_v29 = vpop.f32.mrf.mxu3 }
 0x2a7   :  { %v1125_v31 = vpop.f32.mrf.mxu0 }
 0x2a9   :  { %v1138_v32 = vpop.f32.mrf.mxu1 }
 0x2ab   :  { %v1149_v30 = vpop.f32.mrf.mxu2 }
 0x2ac   :  { %v1164_v33 = vpop.f32.mrf.mxu3 }
 0x2b3   :  { %v1151_v34 = vpop.f32.mrf.mxu2 }
 0x316   :  { %v1190_v35 = vpop.f32.mrf.mxu0  ;;  %v1203_v36 = vpop.f32.mrf.mxu1 }
 0x317   :  { %v1191_v46 = vadd.f32 %v1190_v35, %v1123_v27  ;;  %v1204_v39 = vadd.f32 %v1203_v36, %v1136_v28 }
 0x319   :  { %v1238_v40 = vadd.f32 %v1236_v37, %v1191_v46  ;;  %v1239_v41 = vadd.f32 %v1236_v37, %v1204_v39 }
 0x31a   :  { %v1229_v42 = vpop.f32.mrf.mxu3 }
 0x31b   :  { %1242 = vst [vmem:[%s1692_s7] sm:$0xff] %v1238_v40  ;;  %v1230_v43 = vadd.f32 %v1229_v42, %v1162_v29 }
 0x31c   :  { %1243 = vst [vmem:[%s1692_s7 + $0x8] sm:$0xff] %v1239_v41 }
 0x31d   :  { %v1241_v38 = vadd.f32 %v1236_v37, %v1230_v43 }
 0x31e   :  { %v1192_v45 = vpop.f32.mrf.mxu0  ;;  %v1205_v44 = vpop.f32.mrf.mxu1 }
 0x31f   :  { %1245 = vst [vmem:[%s1692_s7 + $0x18] sm:$0xff] %v1241_v38 }
 0x322   :  { %v1231_v47 = vpop.f32.mrf.mxu3 }
 0x323   :  { %v1216_v48 = vpop.f32.mrf.mxu2 }
 0x324   :  { %v1217_v49 = vadd.f32 %v1216_v48, %v1149_v30 }
 0x326   :  { %v1240_v50 = vadd.f32 %v1236_v37, %v1217_v49 }
 0x328   :  { %1244 = vst [vmem:[%s1692_s7 + $0x10] sm:$0xff] %v1240_v50 }
 0x32b   :  { %v1218_v51 = vpop.f32.mrf.mxu2 }

</bundles_post_ra>
